<compile_context>
chip_gen: v7x
topology: tpu7x:2x2x1
jax: 0.10.0
libtpu: 0.0.40
codegen_flags: <defaults>
</compile_context>

<pallas_src>
import jax
import jax.numpy as jnp
from jax.experimental import pallas as pl
from jax.experimental.pallas import tpu as pltpu


def _round_up(x: int, m: int) -> int:
    return (x + m - 1) // m * m


def _make_loss_kernel(anchor_dim: int):
    A = anchor_dim

    def kernel(pred_ref, gt_ref, out_ref, acc_ref):
        i = pl.program_id(0)

        # ---- init the resident lane-dense accumulator exactly once ----
        @pl.when(i == 0)
        def _init():
            acc_ref[...] = jnp.zeros_like(acc_ref)

        # ---- per-tile lane-dense contribution (all literals are Python floats) ----
        pred = pred_ref[...].astype(jnp.float32)      # (A, tile_r)
        gt = gt_ref[...].astype(jnp.float32)          # (A, tile_r)

        pred_class = pred[A - 1:A, :]                 # (1, tile_r)
        gt_class = gt[A - 1:A, :]                     # (1, tile_r)
        diff = pred[:A - 1, :] - gt[:A - 1, :]        # (A-1, tile_r)

        # loss2 term: zero-padded lanes contribute exactly 0 (gt_class = diff = 0).
        l1 = jnp.abs(gt_class * diff)                 # (A-1, tile_r)

        # loss1 (BCE), two-log form to preserve reference semantics for
        # non-binary gt_class.  Zero-padded lanes contribute exactly 0 in f32:
        # 1.0 + 1e-9 == 1.0 -> log == 0, and 0 * log(1e-9) == 0, so no mask.
        bce = -(gt_class * jnp.log(pred_class + 1e-9)
                + (1.0 - gt_class) * jnp.log(1.0 - pred_class + 1e-9))

        # Per step: one sublane reduce + a VPU add into the resident VMEM
        # vector accumulator.  No cross-lane reduce, no scalar store here.
        acc_ref[...] += jnp.sum(l1, axis=0, keepdims=True) + bce

        # ---- epilogue: single cross-lane reduce + scalar SMEM store ----
        @pl.when(i == pl.num_programs(0) - 1)
        def _epilogue():
            out_ref[0, 0] = jnp.sum(acc_ref[...])

    return kernel


def laneline_loss_3d(pred_3D_lanes, gt_3D_lanes, pred_hcam, gt_hcam,
                     pred_pitch, gt_pitch, *, num_types, anchor_dim, pred_cam):
    N, W, C = pred_3D_lanes.shape
    assert C == num_types * anchor_dim, "last dim must equal num_types*anchor_dim"
    A = anchor_dim
    R = N * W * num_types

    # Lane tile: multiple of 128, capped so the double-buffered input blocks
    # (~2 MiB each at 32768 lanes, sublane-padded f32) fit every generation's
    # scoped-VMEM default with headroom.
    tile_r = min(_round_up(R, 128), 32768)
    r_pad = _round_up(R, tile_r)

    # Layout plumbing only (kernel does the f32 upcast).  allow_input_fusion
    # lets XLA fuse this transpose/pad into the pallas_call input fetch.
    def to_lane_dense(x):
        x2 = x.reshape(R, A).T                        # (A, R), lane-dense R
        if r_pad != R:
            x2 = jnp.pad(x2, ((0, 0), (0, r_pad - R)))
        return x2

    pred2d = to_lane_dense(pred_3D_lanes)
    gt2d = to_lane_dense(gt_3D_lanes)

    kernel = _make_loss_kernel(A)
    lane_loss = pl.pallas_call(
        kernel,
        out_shape=jax.ShapeDtypeStruct((1, 1), jnp.float32),
        grid_spec=pltpu.PrefetchScalarGridSpec(
            num_scalar_prefetch=0,
            grid=(r_pad // tile_r,),
            in_specs=[pl.BlockSpec((A, tile_r), lambda i: (0, i)),
                      pl.BlockSpec((A, tile_r), lambda i: (0, i))],
            out_specs=pl.BlockSpec(memory_space=pltpu.MemorySpace.SMEM),
            scratch_shapes=[pltpu.VMEM((1, tile_r), jnp.float32)],
        ),
        compiler_params=pltpu.CompilerParams(
            dimension_semantics=("arbitrary",),       # reduction axis
            allow_input_fusion=[True, True],          # fuse transpose/pad into fetch
        ),
    )(pred2d, gt2d)[0, 0]

    if not pred_cam:
        return lane_loss

    # loss3: O(N) scalar work; fuses into one tiny XLA op with the final add.
    loss3 = (jnp.sum(jnp.abs(gt_pitch.astype(jnp.float32)
                             - pred_pitch.astype(jnp.float32)))
             + jnp.sum(jnp.abs(gt_hcam.astype(jnp.float32)
                               - pred_hcam.astype(jnp.float32))))
    return lane_loss + loss3


def _reference(pred_3D_lanes, gt_3D_lanes, pred_hcam, gt_hcam,
               pred_pitch, gt_pitch, *, num_types, anchor_dim, pred_cam):
    sizes = pred_3D_lanes.shape
    p = pred_3D_lanes.reshape(sizes[0], sizes[1], num_types, anchor_dim)
    g = gt_3D_lanes.reshape(sizes[0], sizes[1], num_types, anchor_dim)
    pc = p[..., -1:]
    pa = p[..., :-1]
    gc = g[..., -1:]
    ga = g[..., :-1]
    loss1 = -jnp.sum(gc * jnp.log(pc + 1e-09)
                     + (1.0 - gc) * jnp.log(1.0 - pc + 1e-09))
    loss2 = jnp.sum(jnp.sum(jnp.abs(gc * (pa - ga)), axis=3))
    if not pred_cam:
        return loss1 + loss2
    loss3 = jnp.sum(jnp.abs(gt_pitch - pred_pitch)) + jnp.sum(jnp.abs(gt_hcam - pred_hcam))
    return loss1 + loss2 + loss3


if __name__ == "__main__":
    # module config (deterministic, in-script): K=4 anchor points per coord
    num_types = 3
    anchor_dim = 2 * 4 + 1          # 2*K + 1 = 9
    pred_cam = True
    N, W = 2, 16                    # batch, ipm_w/8
    C = num_types * anchor_dim      # 27

    key = jax.random.PRNGKey(0)
    k1, k2, k3, k4, k5, k6 = jax.random.split(key, 6)
    # class scores kept inside (0,1) so log() is well-behaved, as in the module
    pred_lanes = jax.random.uniform(k1, (N, W, C), jnp.float32, 0.01, 0.99)
    gt_lanes = jax.random.uniform(k2, (N, W, C), jnp.float32, 0.0, 1.0)
    # make gt class column binary like real anchors
    gt_lanes = gt_lanes.reshape(N, W, num_types, anchor_dim)
    gt_cls = (gt_lanes[..., -1:] > 0.5).astype(jnp.float32)
    gt_lanes = jnp.concatenate([gt_lanes[..., :-1], gt_cls], axis=-1).reshape(N, W, C)

    pred_hcam = jax.random.uniform(k3, (N,), jnp.float32, 1.4, 1.8)
    gt_hcam = jax.random.uniform(k4, (N,), jnp.float32, 1.4, 1.8)
    pred_pitch = jax.random.uniform(k5, (N,), jnp.float32, -0.1, 0.1)
    gt_pitch = jax.random.uniform(k6, (N,), jnp.float32, -0.1, 0.1)

    loss = laneline_loss_3d(pred_lanes, gt_lanes, pred_hcam, gt_hcam,
                            pred_pitch, gt_pitch,
                            num_types=num_types, anchor_dim=anchor_dim,
                            pred_cam=pred_cam)
    loss = jax.block_until_ready(loss)

    ref = _reference(pred_lanes, gt_lanes, pred_hcam, gt_hcam,
                     pred_pitch, gt_pitch,
                     num_types=num_types, anchor_dim=anchor_dim,
                     pred_cam=pred_cam)
    assert jnp.allclose(loss, ref, rtol=1e-5, atol=1e-4), (loss, ref)
    print("KERNEL_OK")
</pallas_src>

<mosaic_0001>
module attributes {stable_mosaic.version = 11 : i64} {
  func.func @kernel(%arg0: i32, %arg1: memref<9x128xf32, #tpu.memory_space<vmem>>, %arg2: memref<9x128xf32, #tpu.memory_space<vmem>>, %arg3: memref<1x1xf32, #tpu.memory_space<smem>>, %arg4: memref<1x128xf32, #tpu.memory_space<vmem>>) attributes {dimension_semantics = [#tpu.dimension_semantics<arbitrary>], iteration_bounds = array<i64: 1>, scalar_prefetch = 0 : i64, scratch_operands = 1 : i64, tpu.core_type = #tpu.core_type<tc>, window_params = [{transform_indices = @transform_0, window_bounds = array<i64: 9, 128>}, {transform_indices = @transform_1, window_bounds = array<i64: 9, 128>}, {transform_indices = @transform_2, window_bounds = array<i64: 1, 1>}]} {
    %c0_i32 = arith.constant 0 : i32
    %0 = arith.cmpi eq, %arg0, %c0_i32 : i32
    %1 = arith.extui %0 : i1 to i32
    %c0_i32_0 = arith.constant 0 : i32
    %2 = arith.cmpi ne, %1, %c0_i32_0 : i32
    scf.if %2 {
      %cst_15 = arith.constant 0.000000e+00 : f32
      %37 = vector.broadcast %cst_15 : f32 to vector<1x128xf32>
      %c0_16 = arith.constant 0 : index
      %c0_17 = arith.constant 0 : index
      %38 = vector.load %arg4[%c0_16, %c0_17] : memref<1x128xf32, #tpu.memory_space<vmem>>, vector<1x128xf32>
      tpu.vector_store %arg4[%c0_16, %c0_17], %37 {strides = array<i32>} : memref<1x128xf32, #tpu.memory_space<vmem>>, vector<1x128xf32>,
    } else {
    }
    %c0 = arith.constant 0 : index
    %c0_1 = arith.constant 0 : index
    %3 = vector.load %arg1[%c0, %c0_1] : memref<9x128xf32, #tpu.memory_space<vmem>>, vector<9x128xf32>
    %c0_2 = arith.constant 0 : index
    %c0_3 = arith.constant 0 : index
    %4 = vector.load %arg2[%c0_2, %c0_3] : memref<9x128xf32, #tpu.memory_space<vmem>>, vector<9x128xf32>
    %5 = vector.extract_strided_slice %3 {offsets = [8, 0], sizes = [1, 128], strides = [1, 1]} : vector<9x128xf32> to vector<1x128xf32>
    %6 = vector.extract_strided_slice %4 {offsets = [8, 0], sizes = [1, 128], strides = [1, 1]} : vector<9x128xf32> to vector<1x128xf32>
    %7 = vector.extract_strided_slice %3 {offsets = [0, 0], sizes = [8, 128], strides = [1, 1]} : vector<9x128xf32> to vector<8x128xf32>
    %8 = vector.extract_strided_slice %4 {offsets = [0, 0], sizes = [8, 128], strides = [1, 1]} : vector<9x128xf32> to vector<8x128xf32>
    %9 = arith.subf %7, %8 : vector<8x128xf32>
    %10 = vector.broadcast %6 : vector<1x128xf32> to vector<8x128xf32>
    %11 = arith.mulf %10, %9 : vector<8x128xf32>
    %12 = math.absf %11 : vector<8x128xf32>
    %cst = arith.constant 9.99999971E-10 : f32
    %13 = vector.broadcast %cst : f32 to vector<1x128xf32>
    %14 = arith.addf %5, %13 : vector<1x128xf32>
    %15 = math.log %14 : vector<1x128xf32>
    %16 = arith.mulf %6, %15 : vector<1x128xf32>
    %cst_4 = arith.constant 1.000000e+00 : f32
    %17 = vector.broadcast %cst_4 : f32 to vector<1x128xf32>
    %18 = arith.subf %17, %6 : vector<1x128xf32>
    %cst_5 = arith.constant 1.000000e+00 : f32
    %19 = vector.broadcast %cst_5 : f32 to vector<1x128xf32>
    %20 = arith.subf %19, %5 : vector<1x128xf32>
    %cst_6 = arith.constant 9.99999971E-10 : f32
    %21 = vector.broadcast %cst_6 : f32 to vector<1x128xf32>
    %22 = arith.addf %20, %21 : vector<1x128xf32>
    %23 = math.log %22 : vector<1x128xf32>
    %24 = arith.mulf %18, %23 : vector<1x128xf32>
    %25 = arith.addf %16, %24 : vector<1x128xf32>
    %cst_7 = arith.constant 0.000000e+00 : f32
    %26 = vector.broadcast %cst_7 : f32 to vector<1x128xf32>
    %27 = arith.subf %26, %25 : vector<1x128xf32>
    %c0_8 = arith.constant 0 : index
    %c0_9 = arith.constant 0 : index
    %28 = vector.load %arg4[%c0_8, %c0_9] : memref<1x128xf32, #tpu.memory_space<vmem>>, vector<1x128xf32>
    %cst_10 = arith.constant dense<0.000000e+00> : vector<128xf32>
    %29 = vector.multi_reduction <add>, %12, %cst_10 [0] : vector<8x128xf32> to vector<128xf32>
    %30 = vector.shape_cast %29 : vector<128xf32> to vector<1x128xf32>
    %31 = arith.addf %30, %27 : vector<1x128xf32>
    %32 = arith.addf %28, %31 : vector<1x128xf32>
    %c0_11 = arith.constant 0 : index
    %c0_12 = arith.constant 0 : index
    %33 = vector.load %arg4[%c0_11, %c0_12] : memref<1x128xf32, #tpu.memory_space<vmem>>, vector<1x128xf32>
    tpu.vector_store %arg4[%c0_11, %c0_12], %32 {strides = array<i32>} : memref<1x128xf32, #tpu.memory_space<vmem>>, vector<1x128xf32>,
    %c0_i32_13 = arith.constant 0 : i32
    %34 = arith.cmpi eq, %arg0, %c0_i32_13 : i32
    %35 = arith.extui %34 : i1 to i32
    %c0_i32_14 = arith.constant 0 : i32
    %36 = arith.cmpi ne, %35, %c0_i32_14 : i32
    scf.if %36 {
      %c0_15 = arith.constant 0 : index
      %c0_16 = arith.constant 0 : index
      %37 = vector.load %arg4[%c0_15, %c0_16] : memref<1x128xf32, #tpu.memory_space<vmem>>, vector<1x128xf32>
      %38 = vector.shape_cast %37 : vector<1x128xf32> to vector<1x1x128xf32>
      %cst_17 = arith.constant dense<0.000000e+00> : vector<1xf32>
      %39 = vector.multi_reduction <add>, %38, %cst_17 [1, 2] : vector<1x1x128xf32> to vector<1xf32>
      %40 = vector.shape_cast %39 : vector<1xf32> to vector<1x1x1xf32>
      %41 = vector.extract %40[0, 0, 0] : f32 from vector<1x1x1xf32>
      %c0_18 = arith.constant 0 : index
      %c0_19 = arith.constant 0 : index
      %42 = memref.load %arg3[%c0_18, %c0_19] : memref<1x1xf32, #tpu.memory_space<smem>>
      memref.store %41, %arg3[%c0_18, %c0_19] : memref<1x1xf32, #tpu.memory_space<smem>>
    } else {
    }
    return
  }
  func.func @transform_0(%arg0: i32) -> (i32, i32) {
    %c0_i32 = arith.constant 0 : i32
    %c0_i32_0 = arith.constant 0 : i32
    return %c0_i32, %arg0 : i32, i32
  }
  func.func @transform_1(%arg0: i32) -> (i32, i32) {
    %c0_i32 = arith.constant 0 : i32
    %c0_i32_0 = arith.constant 0 : i32
    return %c0_i32, %arg0 : i32, i32
  }
  func.func @transform_2(%arg0: i32) -> (i32, i32) {
    %c0_i32 = arith.constant 0 : i32
    %c0_i32_0 = arith.constant 0 : i32
    %c0_i32_1 = arith.constant 0 : i32
    return %c0_i32, %c0_i32_0 : i32, i32
  }
}

</mosaic_0001>

<bundles_post_ra>
// kernel: tpu_custom_call.1
= control target key start
LH: loop header
LB: loop body
LE: loop exit
PB: predicated region body
PF: predicated region fallthrough
CT: control target
= control target key end

     0   :  { %7 = vsyncpa [#allocation4], 0  ;;  %s239_s0 = inlined_call_operand.hbm [shape: f32[9,128], index: 0, kind: input, shape index: {}]   ;;  %s240_s1 = inlined_call_operand.hbm [shape: f32[9,128], index: 1, kind: input, shape index: {}]   ;;  %s241_s2 = inlined_call_operand.hbm [shape: f32[1,1], index: 2, kind: output, shape index: {}]  }
   0x1   :  { %8 = vsyncpa [#allocation7], 0 }
   0x2   :  { %9 = vsyncpa [#allocation5], 0  ;;  %s182_s9 = smov [#allocation3]   ;;  %s122_s13 = scalar_lea.hbm %s239_s0, 256 }
   0x3   :  { %s15_s10 = sshll.u32 %s182_s9, 4  ;;  %p123_p0 = scmp.ne.s32.totalorder %s239_s0, %s122_s13  ;;  %s16_s10 = int_to_ptr.vmem [resolvable:$true] %s15_s10 }
   0x4   :  { %p126_p1 = scmp.lt.u32.totalorder %s122_s13, %s239_s0 }
   0x6   :  { %p128_p2 = pnand %p126_p1, %p123_p0 }
   0x8   :  { %131 = shalt.err (!%p128_p2)
}
   0x9   :  { %s132_s18 = scalar_lea.vmem %s16_s10, 256  ;;  %p137_p4 = scmp.lt.s32.totalorder %s16_s10, %s16_s10 }
   0xa   :  { %p133_p3 = scmp.ne.s32.totalorder %s16_s10, %s132_s18  ;;  %p138_p5 = scmp.lt.s32.totalorder %s132_s18, %s132_s18 }
   0xc   :  { %p139_p6 = por %p138_p5, %p137_p4 }
   0xe   :  { %p140_p7 = pnand %p139_p6, %p133_p3 }
  0x10   :  { %143 = shalt.err (!%p140_p7)
}
  0x11   :  { %s183_s19 = smov 128   ;;  %s184_s20 = smov 8  }
  0x12   :  { %21 = dma.hbm_to_vmem [thread:$0]  %s239_s0, 256, %s16_s10, [#allocation4], %s183_s19, %s183_s19, %s184_s20  }
  0x13   :  { %s185_s23 = smov [#allocation6]   ;;  %s144_s27 = scalar_lea.hbm %s240_s1, 256 }
  0x14   :  { %s27_s24 = sshll.u32 %s185_s23, 4  ;;  %p145_p8 = scmp.ne.s32.totalorder %s240_s1, %s144_s27  ;;  %s28_s24 = int_to_ptr.vmem [resolvable:$true] %s27_s24 }
  0x15   :  { %p148_p9 = scmp.lt.u32.totalorder %s144_s27, %s240_s1 }
  0x17   :  { %p150_p10 = pnand %p148_p9, %p145_p8 }
  0x19   :  { %153 = shalt.err (!%p150_p10)
}
  0x1a   :  { %s154_s4 = scalar_lea.vmem %s28_s24, 256  ;;  %p159_p12 = scmp.lt.s32.totalorder %s28_s24, %s28_s24 }
  0x1b   :  { %p155_p11 = scmp.ne.s32.totalorder %s28_s24, %s154_s4  ;;  %p160_p13 = scmp.lt.s32.totalorder %s154_s4, %s154_s4 }
  0x1d   :  { %p161_p0 = por %p160_p13, %p159_p12 }
  0x1f   :  { %p162_p1 = pnand %p161_p0, %p155_p11 }
  0x21   :  { %165 = shalt.err (!%p162_p1)
}
  0x22   :  { %33 = dma.hbm_to_vmem [thread:$0]  %s240_s1, 256, %s28_s24, [#allocation7], %s183_s19, %s183_s19, %s184_s20  }
  0x23   :  { %176 = dma.done.wait [#allocation4], 256  }
  0x24   :  { %177 = vsyncadd [#allocation4], 4294967040 }
  0x25   :  { %178 = dma.done.wait [#allocation7], 256  }
  0x26   :  { %179 = vsyncadd [#allocation7], 4294967040  ;;  %v50_v0 = vlaneseq  ;;  %v186_v1 = vmov 0.0   ;;  %v45_v4 = vld [vmem:[#allocation3] sm:$0xff]  ;;  %v46_v5 = vld [vmem:[#allocation3 + $0x8] sm:$0x1] }
  0x27   :  { %44 = vst [vmem:[#allocation2] sm:$0x1] %v186_v1  ;;  %v47_v6 = vld [vmem:[#allocation6] sm:$0xff]  ;;  %v48_v7 = vld [vmem:[#allocation6 + $0x8] sm:$0x1]  ;;  %v61_v10 = vsub.f32 1.0, %v46_v5 }
  0x28   :  { %v51_v2 = vshrl.u32 %v50_v0, 7  ;;  %v49_v8 = vsub.f32 %v45_v4, %v47_v6  ;;  %v56_v9 = vadd.f32 1e-09, %v46_v5  ;;  %v60_v20 = vsub.f32 1.0, %v48_v7  ;;  %s166_s8 = scalar_lea.hbm %s241_s2, 16 }
  0x29   :  { %v62_v12 = vadd.f32 1e-09, %v61_v10  ;;  %vm82_vm0 = vcmask 1040384   ;;  %p167_p2 = scmp.ne.s32.totalorder %s241_s2, %s166_s8  ;;  %p170_p3 = scmp.lt.u32.totalorder %s166_s8, %s241_s2 }
  0x2a   :  { %v52_v3 = vsub.s32 0, %v51_v2  ;;  %118 = vlog2.f32 %v56_v9 }
  0x2b   :  { %120 = vlog2.f32 %v62_v12  ;;  %p172_p4 = pnand %p170_p3, %p167_p2 }
  0x2c   :  { %v53_v11 = vrot.slane %v48_v7, %v52_v3 }
  0x2e   :  { %v54_v13 = vmul.f32 %v53_v11, %v49_v8  ;;  %v68_v30 = vld [vmem:[#allocation2] sm:$0x1] }
  0x30   :  { %v55_v14 = vand.u32 2147483647, %v54_v13 }
  0x32   :  { %v69_v15 = vrot.slane %v55_v14, 4 }
  0x34   :  { %v70_v16 = vadd.f32 %v69_v15, %v55_v14  ;;  %v119_v18 = vpop.eup %118 }
  0x35   :  { %v58_v19 = vmul.f32 0.6931472, %v119_v18  ;;  %v121_v22 = vpop.eup %120 }
  0x36   :  { %v71_v17 = vrot.slane %v70_v16, 2  ;;  %v64_v24 = vmul.f32 0.6931472, %v121_v22 }
  0x37   :  { %v59_v23 = vmul.f32 %v58_v19, %v48_v7 }
  0x38   :  { %v72_v21 = vadd.f32 %v71_v17, %v70_v16  ;;  %v65_v26 = vmul.f32 %v64_v24, %v60_v20 }
  0x3a   :  { %v73_v25 = vrot.slane %v72_v21, 1  ;;  %v66_v27 = vadd.f32 %v65_v26, %v59_v23 }
  0x3c   :  { %v74_v28 = vadd.f32 %v73_v25, %v72_v21  ;;  %v67_v29 = vsub.f32 0.0, %v66_v27 }
  0x3e   :  { %v75_v31 = vadd.f32 %v74_v28, %v67_v29 }
  0x40   :  { %v76_v32 = vadd.f32 %v75_v31, %v68_v30 }
  0x42   :  { %77 = vst [vmem:[#allocation2] sm:$0x1] %v76_v32 }
  0x49   :  { %v81_v33 = vld [vmem:[#allocation2] sm:$0x1] }
  0x4a   :  { %v83_v34 = vsel %vm82_vm0, %v81_v33, 0.0 }
  0x4b   :  { %84 = vadd.xlane.f32.xlu0 %v83_v34 }
  0xd8   :  { %v85_v35 = vpop.xlane.xlu0 %84 }
  0xd9   :  { %v86_v36 = vrot.slane %v85_v35, 4 }
  0xdb   :  { %v87_v37 = vadd.f32 %v86_v36, %v85_v35 }
  0xdd   :  { %v88_v38 = vrot.slane %v87_v37, 2 }
  0xdf   :  { %v89_v39 = vadd.f32 %v88_v38, %v87_v37 }
  0xe1   :  { %v90_v40 = vrot.slane %v89_v39, 1 }
  0xe3   :  { %v91_v41 = vadd.f32 %v90_v40, %v89_v39 }
  0xe5   :  { %110 = vpush %v91_v41 }
 0x116   :  { %s111_s1 = spop %110 }
 0x117   :  { %94 = sst [smem:[#allocation8]] %s111_s1 }
 0x118   :  { %175 = shalt.err (!%p172_p4)
}
 0x119   :  { %s187_s13 = smov [#allocation8]  }
 0x11a   :  { %102 = dma.smem_to_hbm %s187_s13, 16, %s241_s2, [#allocation5]  }
 0x11b   :  { %180 = dma.done.wait [#allocation5], 16  }
 0x11c   :  { %181 = vsyncadd [#allocation5], 4294967280 }
 0x11d   :  { %106 = sfence }
 0x11e   :  { %107 = vsyncpa [#allocation4], 1 }
 0x11f   :  { %108 = vsyncpa [#allocation7], 1 }
 0x120   :  { %109 = vsyncpa [#allocation5], 1 }

</bundles_post_ra>
